<compile_context>
chip_gen: v7x
topology: tpu7x:2x2x1
jax: 0.10.0
libtpu: 0.0.40
codegen_flags: <defaults>
</compile_context>

<pallas_src>
import jax
import jax.numpy as jnp
from jax.experimental import pallas as pl
from jax.experimental.pallas import tpu as pltpu

LANE = 128  # lane width on v5e/v6e/v7x


def _round_up(x: int, m: int) -> int:
    return ((x + m - 1) // m) * m


def _make_decoder_kernel(n_layers: int, batch: int, eps: float = 1e-5):
    """Kernel closed over the static layer count and batch size."""
    inv_b = 1.0 / float(batch)

    def kernel(x_ref, w_ref, gamma_ref, beta_ref, w_out_ref, b_out_ref, out_ref):
        # x_ref:     (B, D)            padded activations (f32)
        # w_ref:     (n_layers, D, D)  stacked hidden-layer weights (in, out)
        # gamma_ref: (n_layers, D)     BN gamma rows (zero in padded lanes)
        # beta_ref:  (n_layers, D)     BN beta rows  (zero in padded lanes)
        # w_out_ref: (D, D_out)        output weight (in, out)
        # b_out_ref: (1, D_out)        output bias row
        h = x_ref[...]
        for layer in range(n_layers):
            w = w_ref[layer]  # static index -> no dynamic slice
            # Linear without bias (bias is cancelled by the BN mean-subtract).
            h = jnp.dot(h, w, preferred_element_type=jnp.float32)

            # One-pass training-mode batch stats (biased variance).
            mean = jnp.sum(h, axis=0, keepdims=True) * inv_b            # (1, D)
            meansq = jnp.sum(h * h, axis=0, keepdims=True) * inv_b      # (1, D)
            var = meansq - mean * mean

            # Fuse BN normalize + affine into a single per-feature scale/shift.
            scale = gamma_ref[layer : layer + 1, :] * jax.lax.rsqrt(var + eps)
            shift = beta_ref[layer : layer + 1, :] - mean * scale
            # Padded lanes have gamma = beta = 0 -> scale = shift = 0 -> stay zero.
            h = jnp.maximum(h * scale + shift, 0.0)                      # BN + ReLU

        out_ref[...] = (
            jnp.dot(h, w_out_ref[...], preferred_element_type=jnp.float32)
            + b_out_ref[...]
        ).astype(out_ref.dtype)

    return kernel


def _pad2(a, rows, cols):
    return jnp.pad(a, ((0, rows - a.shape[0]), (0, cols - a.shape[1])))


def _pad1(a, n):
    return jnp.pad(a, (0, n - a.shape[0]))


def decoder_forward(x, params, *, n_layers: int):
    """Run the decoder.

    x:      (B, latent_dim) float32
    params: dict with torch-layout parameters (see init_decoder_params).
    """
    B, latent_dim = x.shape
    hidden_dim = params["w"][0].shape[0]
    input_dim = params["w_out"].shape[0]

    # One common padded feature width D for latent/hidden, D_out for the output.
    D = max(_round_up(latent_dim, LANE), _round_up(hidden_dim, LANE))
    D_out = _round_up(input_dim, LANE)

    f32 = jnp.float32

    # ---- pack & pad parameters (zero padding everywhere) -------------------
    # Hidden-layer weights: torch (out, in) -> (in, out), padded to (D, D),
    # stacked into one (n_layers, D, D) tensor.
    w_stack = jnp.stack([_pad2(w.T.astype(f32), D, D) for w in params["w"]])
    gamma_stack = jnp.stack([_pad1(g.astype(f32), D) for g in params["gamma"]])
    beta_stack = jnp.stack([_pad1(b.astype(f32), D) for b in params["beta"]])
    # Hidden-layer biases are intentionally NOT passed (cancelled by BN).

    w_out_p = _pad2(params["w_out"].T.astype(f32), D, D_out)        # (D, D_out)
    b_out_p = _pad1(params["b_out"].astype(f32), D_out)[None, :]    # (1, D_out)

    # Lane-pad the activations (batch already sublane-friendly).
    x_pad = _pad2(x.astype(f32), B, D)

    kernel = _make_decoder_kernel(n_layers, B)
    vmem_spec = pl.BlockSpec(memory_space=pltpu.MemorySpace.VMEM)

    # Explicit VMEM budget sized to what is actually resident (+headroom).
    resident_bytes = (
        x_pad.size + w_stack.size + gamma_stack.size + beta_stack.size
        + w_out_p.size + b_out_p.size + B * D_out
    ) * 4
    vmem_limit = int(min(max(4 * resident_bytes, 16 * 2**20), 64 * 2**20))

    out_pad = pl.pallas_call(
        kernel,
        out_shape=jax.ShapeDtypeStruct((B, D_out), f32),
        in_specs=[vmem_spec] * 6,
        out_specs=vmem_spec,
        compiler_params=pltpu.CompilerParams(vmem_limit_bytes=vmem_limit),
    )(x_pad, w_stack, gamma_stack, beta_stack, w_out_p, b_out_p)

    return out_pad[:, :input_dim]


def init_decoder_params(key, latent_dim, hidden_dim, input_dim, n_layers):
    """Deterministic synthetic parameters in torch layout (weight = (out, in))."""
    ws, bs, gammas, betas = [], [], [], []
    in_dim = latent_dim
    for layer in range(n_layers):
        key, kw, kb = jax.random.split(key, 3)
        ws.append(0.1 * jax.random.normal(kw, (hidden_dim, in_dim), jnp.float32))
        bs.append(0.05 * jax.random.normal(kb, (hidden_dim,), jnp.float32))
        gammas.append(jnp.full((hidden_dim,), 1.0 + 0.01 * layer, jnp.float32))
        betas.append(jnp.full((hidden_dim,), 0.02 * layer, jnp.float32))
        in_dim = hidden_dim
    key, kw, kb = jax.random.split(key, 3)
    w_out = 0.1 * jax.random.normal(kw, (input_dim, hidden_dim), jnp.float32)
    b_out = 0.05 * jax.random.normal(kb, (input_dim,), jnp.float32)
    return {"w": ws, "b": bs, "gamma": gammas, "beta": betas,
            "w_out": w_out, "b_out": b_out}


def decoder_reference(x, params, *, n_layers: int, eps: float = 1e-5):
    """Pure-JAX reference faithful to the PyTorch module (biases included)."""
    h = x
    for l in range(n_layers):
        h = h @ params["w"][l].T + params["b"][l]
        mean = jnp.mean(h, axis=0, keepdims=True)
        var = jnp.mean((h - mean) ** 2, axis=0, keepdims=True)
        h = (h - mean) / jnp.sqrt(var + eps) * params["gamma"][l] + params["beta"][l]
        h = jnp.maximum(h, 0.0)
    return h @ params["w_out"].T + params["b_out"]


if __name__ == "__main__":
    # Small config consistent with the module:
    #   latent_dim = encoder_emo.latent_dim + encoder_spk.latent_dim = 8 + 8
    latent_emo, latent_spk = 8, 8
    latent_dim = latent_emo + latent_spk
    hidden_dim = 32
    input_dim = 24
    n_layers = 3
    batch = 8  # multiple of 8 -> sublane-dense; BN stats are over this full batch

    key = jax.random.PRNGKey(0)
    key, kx = jax.random.split(key)
    x = jax.random.normal(kx, (batch, latent_dim), jnp.float32)

    params = init_decoder_params(key, latent_dim, hidden_dim, input_dim, n_layers)

    out = decoder_forward(x, params, n_layers=n_layers)
    out = jax.block_until_ready(out)

    ref = decoder_reference(x, params, n_layers=n_layers)
    assert out.shape == (batch, input_dim)
    assert jnp.allclose(out, ref, atol=1e-4, rtol=1e-4), "mismatch vs reference"

    print("KERNEL_OK")
</pallas_src>

<mosaic_0001>
module attributes {stable_mosaic.version = 11 : i64} {
  func.func @kernel(%arg0: memref<8x128xf32, #tpu.memory_space<vmem>>, %arg1: memref<3x128x128xf32, #tpu.memory_space<vmem>>, %arg2: memref<3x128xf32, #tpu.memory_space<vmem>>, %arg3: memref<3x128xf32, #tpu.memory_space<vmem>>, %arg4: memref<128x128xf32, #tpu.memory_space<vmem>>, %arg5: memref<1x128xf32, #tpu.memory_space<vmem>>, %arg6: memref<8x128xf32, #tpu.memory_space<vmem>>) attributes {dimension_semantics = [], scalar_prefetch = 0 : i64, scratch_operands = 0 : i64, tpu.core_type = #tpu.core_type<tc>} {
    %c0 = arith.constant 0 : index
    %c0_0 = arith.constant 0 : index
    %0 = vector.load %arg0[%c0, %c0_0] : memref<8x128xf32, #tpu.memory_space<vmem>>, vector<8x128xf32>
    %c0_1 = arith.constant 0 : index
    %c0_2 = arith.constant 0 : index
    %c0_3 = arith.constant 0 : index
    %1 = vector.load %arg1[%c0_1, %c0_2, %c0_3] : memref<3x128x128xf32, #tpu.memory_space<vmem>>, vector<1x128x128xf32>
    %2 = vector.shape_cast %1 : vector<1x128x128xf32> to vector<128x128xf32>
    %cst = arith.constant dense<0.000000e+00> : vector<8x128xf32>
    %3 = tpu.matmul %0, %2, %cst {dimension_numbers = #tpu.dot_dimension_numbers<[1], [0], [0], [1], [0, 0, 1, 1], [], []>} : vector<8x128xf32>, vector<128x128xf32>, vector<8x128xf32> -> vector<8x128xf32>
    %cst_4 = arith.constant dense<0.000000e+00> : vector<128xf32>
    %4 = vector.multi_reduction <add>, %3, %cst_4 [0] : vector<8x128xf32> to vector<128xf32>
    %5 = vector.shape_cast %4 : vector<128xf32> to vector<1x128xf32>
    %cst_5 = arith.constant 1.250000e-01 : f32
    %6 = vector.broadcast %cst_5 : f32 to vector<1x128xf32>
    %7 = arith.mulf %5, %6 : vector<1x128xf32>
    %8 = arith.mulf %3, %3 : vector<8x128xf32>
    %cst_6 = arith.constant dense<0.000000e+00> : vector<128xf32>
    %9 = vector.multi_reduction <add>, %8, %cst_6 [0] : vector<8x128xf32> to vector<128xf32>
    %10 = vector.shape_cast %9 : vector<128xf32> to vector<1x128xf32>
    %cst_7 = arith.constant 1.250000e-01 : f32
    %11 = vector.broadcast %cst_7 : f32 to vector<1x128xf32>
    %12 = arith.mulf %10, %11 : vector<1x128xf32>
    %13 = arith.mulf %7, %7 : vector<1x128xf32>
    %14 = arith.subf %12, %13 : vector<1x128xf32>
    %c0_8 = arith.constant 0 : index
    %c0_9 = arith.constant 0 : index
    %15 = vector.load %arg2[%c0_8, %c0_9] : memref<3x128xf32, #tpu.memory_space<vmem>>, vector<1x128xf32>
    %cst_10 = arith.constant 9.99999974E-6 : f32
    %16 = vector.broadcast %cst_10 : f32 to vector<1x128xf32>
    %17 = arith.addf %14, %16 : vector<1x128xf32>
    %18 = math.rsqrt %17 : vector<1x128xf32>
    %19 = arith.mulf %15, %18 : vector<1x128xf32>
    %c0_11 = arith.constant 0 : index
    %c0_12 = arith.constant 0 : index
    %20 = vector.load %arg3[%c0_11, %c0_12] : memref<3x128xf32, #tpu.memory_space<vmem>>, vector<1x128xf32>
    %21 = arith.mulf %7, %19 : vector<1x128xf32>
    %22 = arith.subf %20, %21 : vector<1x128xf32>
    %23 = vector.broadcast %19 : vector<1x128xf32> to vector<8x128xf32>
    %24 = arith.mulf %3, %23 : vector<8x128xf32>
    %25 = vector.broadcast %22 : vector<1x128xf32> to vector<8x128xf32>
    %26 = arith.addf %24, %25 : vector<8x128xf32>
    %cst_13 = arith.constant 0.000000e+00 : f32
    %27 = vector.broadcast %cst_13 : f32 to vector<8x128xf32>
    %28 = arith.maximumf %26, %27 : vector<8x128xf32>
    %c1 = arith.constant 1 : index
    %c0_14 = arith.constant 0 : index
    %c0_15 = arith.constant 0 : index
    %29 = vector.load %arg1[%c1, %c0_14, %c0_15] : memref<3x128x128xf32, #tpu.memory_space<vmem>>, vector<1x128x128xf32>
    %30 = vector.shape_cast %29 : vector<1x128x128xf32> to vector<128x128xf32>
    %cst_16 = arith.constant dense<0.000000e+00> : vector<8x128xf32>
    %31 = tpu.matmul %28, %30, %cst_16 {dimension_numbers = #tpu.dot_dimension_numbers<[1], [0], [0], [1], [0, 0, 1, 1], [], []>} : vector<8x128xf32>, vector<128x128xf32>, vector<8x128xf32> -> vector<8x128xf32>
    %cst_17 = arith.constant dense<0.000000e+00> : vector<128xf32>
    %32 = vector.multi_reduction <add>, %31, %cst_17 [0] : vector<8x128xf32> to vector<128xf32>
    %33 = vector.shape_cast %32 : vector<128xf32> to vector<1x128xf32>
    %cst_18 = arith.constant 1.250000e-01 : f32
    %34 = vector.broadcast %cst_18 : f32 to vector<1x128xf32>
    %35 = arith.mulf %33, %34 : vector<1x128xf32>
    %36 = arith.mulf %31, %31 : vector<8x128xf32>
    %cst_19 = arith.constant dense<0.000000e+00> : vector<128xf32>
    %37 = vector.multi_reduction <add>, %36, %cst_19 [0] : vector<8x128xf32> to vector<128xf32>
    %38 = vector.shape_cast %37 : vector<128xf32> to vector<1x128xf32>
    %cst_20 = arith.constant 1.250000e-01 : f32
    %39 = vector.broadcast %cst_20 : f32 to vector<1x128xf32>
    %40 = arith.mulf %38, %39 : vector<1x128xf32>
    %41 = arith.mulf %35, %35 : vector<1x128xf32>
    %42 = arith.subf %40, %41 : vector<1x128xf32>
    %c1_21 = arith.constant 1 : index
    %c0_22 = arith.constant 0 : index
    %43 = vector.load %arg2[%c1_21, %c0_22] : memref<3x128xf32, #tpu.memory_space<vmem>>, vector<1x128xf32>
    %cst_23 = arith.constant 9.99999974E-6 : f32
    %44 = vector.broadcast %cst_23 : f32 to vector<1x128xf32>
    %45 = arith.addf %42, %44 : vector<1x128xf32>
    %46 = math.rsqrt %45 : vector<1x128xf32>
    %47 = arith.mulf %43, %46 : vector<1x128xf32>
    %c1_24 = arith.constant 1 : index
    %c0_25 = arith.constant 0 : index
    %48 = vector.load %arg3[%c1_24, %c0_25] : memref<3x128xf32, #tpu.memory_space<vmem>>, vector<1x128xf32>
    %49 = arith.mulf %35, %47 : vector<1x128xf32>
    %50 = arith.subf %48, %49 : vector<1x128xf32>
    %51 = vector.broadcast %47 : vector<1x128xf32> to vector<8x128xf32>
    %52 = arith.mulf %31, %51 : vector<8x128xf32>
    %53 = vector.broadcast %50 : vector<1x128xf32> to vector<8x128xf32>
    %54 = arith.addf %52, %53 : vector<8x128xf32>
    %cst_26 = arith.constant 0.000000e+00 : f32
    %55 = vector.broadcast %cst_26 : f32 to vector<8x128xf32>
    %56 = arith.maximumf %54, %55 : vector<8x128xf32>
    %c2 = arith.constant 2 : index
    %c0_27 = arith.constant 0 : index
    %c0_28 = arith.constant 0 : index
    %57 = vector.load %arg1[%c2, %c0_27, %c0_28] : memref<3x128x128xf32, #tpu.memory_space<vmem>>, vector<1x128x128xf32>
    %58 = vector.shape_cast %57 : vector<1x128x128xf32> to vector<128x128xf32>
    %cst_29 = arith.constant dense<0.000000e+00> : vector<8x128xf32>
    %59 = tpu.matmul %56, %58, %cst_29 {dimension_numbers = #tpu.dot_dimension_numbers<[1], [0], [0], [1], [0, 0, 1, 1], [], []>} : vector<8x128xf32>, vector<128x128xf32>, vector<8x128xf32> -> vector<8x128xf32>
    %cst_30 = arith.constant dense<0.000000e+00> : vector<128xf32>
    %60 = vector.multi_reduction <add>, %59, %cst_30 [0] : vector<8x128xf32> to vector<128xf32>
    %61 = vector.shape_cast %60 : vector<128xf32> to vector<1x128xf32>
    %cst_31 = arith.constant 1.250000e-01 : f32
    %62 = vector.broadcast %cst_31 : f32 to vector<1x128xf32>
    %63 = arith.mulf %61, %62 : vector<1x128xf32>
    %64 = arith.mulf %59, %59 : vector<8x128xf32>
    %cst_32 = arith.constant dense<0.000000e+00> : vector<128xf32>
    %65 = vector.multi_reduction <add>, %64, %cst_32 [0] : vector<8x128xf32> to vector<128xf32>
    %66 = vector.shape_cast %65 : vector<128xf32> to vector<1x128xf32>
    %cst_33 = arith.constant 1.250000e-01 : f32
    %67 = vector.broadcast %cst_33 : f32 to vector<1x128xf32>
    %68 = arith.mulf %66, %67 : vector<1x128xf32>
    %69 = arith.mulf %63, %63 : vector<1x128xf32>
    %70 = arith.subf %68, %69 : vector<1x128xf32>
    %c2_34 = arith.constant 2 : index
    %c0_35 = arith.constant 0 : index
    %71 = vector.load %arg2[%c2_34, %c0_35] : memref<3x128xf32, #tpu.memory_space<vmem>>, vector<1x128xf32>
    %cst_36 = arith.constant 9.99999974E-6 : f32
    %72 = vector.broadcast %cst_36 : f32 to vector<1x128xf32>
    %73 = arith.addf %70, %72 : vector<1x128xf32>
    %74 = math.rsqrt %73 : vector<1x128xf32>
    %75 = arith.mulf %71, %74 : vector<1x128xf32>
    %c2_37 = arith.constant 2 : index
    %c0_38 = arith.constant 0 : index
    %76 = vector.load %arg3[%c2_37, %c0_38] : memref<3x128xf32, #tpu.memory_space<vmem>>, vector<1x128xf32>
    %77 = arith.mulf %63, %75 : vector<1x128xf32>
    %78 = arith.subf %76, %77 : vector<1x128xf32>
    %79 = vector.broadcast %75 : vector<1x128xf32> to vector<8x128xf32>
    %80 = arith.mulf %59, %79 : vector<8x128xf32>
    %81 = vector.broadcast %78 : vector<1x128xf32> to vector<8x128xf32>
    %82 = arith.addf %80, %81 : vector<8x128xf32>
    %cst_39 = arith.constant 0.000000e+00 : f32
    %83 = vector.broadcast %cst_39 : f32 to vector<8x128xf32>
    %84 = arith.maximumf %82, %83 : vector<8x128xf32>
    %c0_40 = arith.constant 0 : index
    %c0_41 = arith.constant 0 : index
    %85 = vector.load %arg4[%c0_40, %c0_41] : memref<128x128xf32, #tpu.memory_space<vmem>>, vector<128x128xf32>
    %cst_42 = arith.constant dense<0.000000e+00> : vector<8x128xf32>
    %86 = tpu.matmul %84, %85, %cst_42 {dimension_numbers = #tpu.dot_dimension_numbers<[1], [0], [0], [1], [0, 0, 1, 1], [], []>} : vector<8x128xf32>, vector<128x128xf32>, vector<8x128xf32> -> vector<8x128xf32>
    %c0_43 = arith.constant 0 : index
    %c0_44 = arith.constant 0 : index
    %87 = vector.load %arg5[%c0_43, %c0_44] : memref<1x128xf32, #tpu.memory_space<vmem>>, vector<1x128xf32>
    %88 = vector.broadcast %87 : vector<1x128xf32> to vector<8x128xf32>
    %89 = arith.addf %86, %88 : vector<8x128xf32>
    %c0_45 = arith.constant 0 : index
    %c0_46 = arith.constant 0 : index
    %90 = vector.load %arg6[%c0_45, %c0_46] : memref<8x128xf32, #tpu.memory_space<vmem>>, vector<8x128xf32>
    tpu.vector_store %arg6[%c0_45, %c0_46], %89 {strides = array<i32>} : memref<8x128xf32, #tpu.memory_space<vmem>>, vector<8x128xf32>,
    return
  }
}

</mosaic_0001>

<bundles_post_ra>
// kernel: tpu_custom_call.1
= control target key start
LH: loop header
LB: loop body
LE: loop exit
PB: predicated region body
PF: predicated region fallthrough
CT: control target
= control target key end

     0   :  { %11 = vsyncpa [#allocation3], 0  ;;  %s1120_s0 = inlined_call_operand.hbm [shape: f32[8,128], index: 0, kind: input, shape index: {}]   ;;  %s1121_s1 = inlined_call_operand.hbm [shape: f32[3,128,128], index: 1, kind: input, shape index: {}]   ;;  %s1122_s2 = inlined_call_operand.vmem [shape: f32[3,128], index: 2, kind: input, shape index: {}]   ;;  %s1123_s3 = inlined_call_operand.vmem [shape: f32[3,128], index: 3, kind: input, shape index: {}]   ;;  %s1124_s4 = inlined_call_operand.hbm [shape: f32[128,128], index: 4, kind: input, shape index: {}]   ;;  %s1125_s5 = inlined_call_operand.vmem [shape: f32[1,128], index: 5, kind: input, shape index: {}]   ;;  %s1126_s6 = inlined_call_operand.hbm [shape: f32[8,128], index: 6, kind: output, shape index: {}]  }
   0x1   :  { %12 = vsyncpa [#allocation6], 0 }
   0x2   :  { %13 = vsyncpa [#allocation4], 0  ;;  %s953_s21 = smov [#allocation5]   ;;  %s859_s25 = scalar_lea.hbm %s1121_s1, 6144 }
   0x3   :  { %s29_s22 = sshll.u32 %s953_s21, 4  ;;  %p860_p0 = scmp.ne.s32.totalorder %s1121_s1, %s859_s25  ;;  %s30_s22 = int_to_ptr.vmem [resolvable:$true] %s29_s22 }
   0x4   :  { %p863_p1 = scmp.lt.u32.totalorder %s859_s25, %s1121_s1 }
   0x6   :  { %p865_p2 = pnand %p863_p1, %p860_p0 }
   0x8   :  { %868 = shalt.err (!%p865_p2)
}
   0x9   :  { %s869_s30 = scalar_lea.vmem %s30_s22, 6144  ;;  %p874_p4 = scmp.lt.s32.totalorder %s30_s22, %s30_s22 }
   0xa   :  { %p870_p3 = scmp.ne.s32.totalorder %s30_s22, %s869_s30  ;;  %p875_p5 = scmp.lt.s32.totalorder %s869_s30, %s869_s30 }
   0xc   :  { %p876_p6 = por %p875_p5, %p874_p4 }
   0xe   :  { %p877_p7 = pnand %p876_p6, %p870_p3 }
  0x10   :  { %880 = shalt.err (!%p877_p7)
}
  0x11   :  { %s954_s7 = smov 128   ;;  %s955_s8 = smov 8  }
  0x12   :  { %35 = dma.hbm_to_vmem [thread:$0]  %s1121_s1, 6144, %s30_s22, [#allocation6], %s954_s7, %s954_s7, %s955_s8  }
  0x13   :  { %s956_s11 = smov [#allocation2]   ;;  %s957_s13 = smov [#allocation7]  }
  0x14   :  { %s20_s12 = sshll.u32 %s956_s11, 4  ;;  %s45_s14 = sshll.u32 %s957_s13, 4  ;;  %s21_s12 = int_to_ptr.vmem [resolvable:$true] %s20_s12  ;;  %s46_s14 = int_to_ptr.vmem [resolvable:$true] %s45_s14 }
  0x15   :  { %s881_s17 = scalar_lea.hbm %s1120_s0, 128 }
  0x16   :  { %p882_p8 = scmp.ne.s32.totalorder %s1120_s0, %s881_s17  ;;  %p885_p9 = scmp.lt.u32.totalorder %s881_s17, %s1120_s0 }
  0x18   :  { %p887_p10 = pnand %p885_p9, %p882_p8 }
  0x1a   :  { %890 = shalt.err (!%p887_p10)
}
  0x1b   :  { %s891_s1 = scalar_lea.vmem %s21_s12, 128  ;;  %p896_p12 = scmp.lt.s32.totalorder %s21_s12, %s21_s12 }
  0x1c   :  { %p892_p11 = scmp.ne.s32.totalorder %s21_s12, %s891_s1  ;;  %p897_p13 = scmp.lt.s32.totalorder %s891_s1, %s891_s1 }
  0x1e   :  { %p898_p0 = por %p897_p13, %p896_p12 }
  0x20   :  { %p899_p1 = pnand %p898_p0, %p892_p11 }
  0x22   :  { %902 = shalt.err (!%p899_p1)
}
  0x23   :  { %23 = dma.hbm_to_vmem [thread:$0]  %s1120_s0, 128, %s21_s12, [#allocation3]  }
  0x24   :  { %s903_s26 = scalar_lea.hbm %s1124_s4, 2048 }
  0x25   :  { %p904_p2 = scmp.ne.s32.totalorder %s1124_s4, %s903_s26  ;;  %p907_p3 = scmp.lt.u32.totalorder %s903_s26, %s1124_s4 }
  0x27   :  { %p909_p4 = pnand %p907_p3, %p904_p2 }
  0x29   :  { %912 = shalt.err (!%p909_p4)
}
  0x2a   :  { %s913_s9 = scalar_lea.vmem %s46_s14, 2048  ;;  %p918_p6 = scmp.lt.s32.totalorder %s46_s14, %s46_s14 }
  0x2b   :  { %p914_p5 = scmp.ne.s32.totalorder %s46_s14, %s913_s9  ;;  %p919_p7 = scmp.lt.s32.totalorder %s913_s9, %s913_s9 }
  0x2d   :  { %p920_p8 = por %p919_p7, %p918_p6 }
  0x2f   :  { %p921_p9 = pnand %p920_p8, %p914_p5 }
  0x31   :  { %924 = shalt.err (!%p921_p9)
}
  0x32   :  { %51 = dma.hbm_to_vmem [thread:$0]  %s1124_s4, 2048, %s46_s14, [#allocation6], %s954_s7, %s954_s7, %s955_s8  }
  0x33   :  { %947 = dma.done.wait [#allocation3], 128  }
  0x34   :  { %948 = vsyncadd [#allocation3], 4294967168 }
  0x35   :  { %949 = dma.done.wait [#allocation6], 8192  }
  0x36   :  { %950 = vsyncadd [#allocation6], 4294959104  ;;  %v958_v0 = vmov 0.0|0.0   ;;  %vm959_vm0 = vmmov 0   ;;  %v960_v1 = vmov 0.0   ;;  %v64_v2 = vld [vmem:[#allocation5] sm:$0xff] }
  0x37   :  { %748 = vmatprep.subr.bf16.mxu0 %v958_v0  ;;  %640 = vmatprep.mubr.msk.f32.mxu0 %vm959_vm0, %v960_v1  ;;  %v65_v3 = vld [vmem:[#allocation5 + $0x8] sm:$0xff]  ;;  %v66_v4 = vld [vmem:[#allocation5 + $0x10] sm:$0xff]  ;;  %v67_v6 = vld [vmem:[#allocation5 + $0x18] sm:$0xff] }
  0x38   :  { %772 = vmatprep.subr.bf16.mxu1 %v958_v0  ;;  %675 = vmatprep.mubr.msk.f32.mxu1 %vm959_vm0, %v960_v1  ;;  %v749_v5 = vpack.c.bf16 %v65_v3, %v64_v2  ;;  %v752_v7 = vpack.c.bf16 %v67_v6, %v66_v4  ;;  %v68_v8 = vld [vmem:[#allocation5 + $0x20] sm:$0xff]  ;;  %v69_v9 = vld [vmem:[#allocation5 + $0x28] sm:$0xff]  ;;  %v70_v11 = vld [vmem:[#allocation5 + $0x30] sm:$0xff] }
  0x39   :  { %v755_v10 = vpack.c.bf16 %v69_v9, %v68_v8  ;;  %v71_v12 = vld [vmem:[#allocation5 + $0x38] sm:$0xff]  ;;  %v72_v14 = vld [vmem:[#allocation5 + $0x40] sm:$0xff]  ;;  %v73_v15 = vld [vmem:[#allocation5 + $0x48] sm:$0xff]  ;;  %v174_v9 = vlaneseq }
  0x3a   :  { %750 = vmatpush3.bf16.msra.mxu0 %v749_v5  ;;  %v758_v13 = vpack.c.bf16 %v71_v12, %v70_v11  ;;  %v761_v16 = vpack.c.bf16 %v73_v15, %v72_v14  ;;  %v74_v17 = vld [vmem:[#allocation5 + $0x50] sm:$0xff]  ;;  %v75_v18 = vld [vmem:[#allocation5 + $0x58] sm:$0xff]  ;;  %v76_v20 = vld [vmem:[#allocation5 + $0x60] sm:$0xff] }
  0x3b   :  { %751 = vmatprep.subr.bf16.mxu0 %v958_v0  ;;  %v764_v19 = vpack.c.bf16 %v75_v18, %v74_v17  ;;  %v77_v21 = vld [vmem:[#allocation5 + $0x68] sm:$0xff]  ;;  %v78_v23 = vld [vmem:[#allocation5 + $0x70] sm:$0xff]  ;;  %v79_v24 = vld [vmem:[#allocation5 + $0x78] sm:$0xff] }
  0x3c   :  { %v767_v22 = vpack.c.bf16 %v77_v21, %v76_v20  ;;  %v770_v25 = vpack.c.bf16 %v79_v24, %v78_v23  ;;  %v63_v26 = vld [vmem:[#allocation2] sm:$0xff]  ;;  %v186_v27 = vld [vmem:[#allocation5 + $0x80] sm:$0xff]  ;;  %v187_v28 = vld [vmem:[#allocation5 + $0x88] sm:$0xff] }
  0x3d   :  { %v773_v29 = vpack.c.bf16 %v187_v28, %v186_v27  ;;  %v188_v30 = vld [vmem:[#allocation5 + $0x90] sm:$0xff]  ;;  %v189_v31 = vld [vmem:[#allocation5 + $0x98] sm:$0xff]  ;;  %v190_v33 = vld [vmem:[#allocation5 + $0xa0] sm:$0xff] }
  0x3e   :  { %753 = vmatpush3.bf16.msra.mxu0 %v752_v7  ;;  %v776_v32 = vpack.c.bf16 %v189_v31, %v188_v30  ;;  %v191_v34 = vld [vmem:[#allocation5 + $0xa8] sm:$0xff]  ;;  %v192_v36 = vld [vmem:[#allocation5 + $0xb0] sm:$0xff]  ;;  %v193_v37 = vld [vmem:[#allocation5 + $0xb8] sm:$0xff] }
  0x3f   :  { %754 = vmatprep.subr.bf16.mxu0 %v958_v0  ;;  %774 = vmatpush3.bf16.msra.mxu1 %v773_v29  ;;  %v779_v35 = vpack.c.bf16 %v191_v34, %v190_v33  ;;  %v782_v38 = vpack.c.bf16 %v193_v37, %v192_v36  ;;  %v194_v39 = vld [vmem:[#allocation5 + $0xc0] sm:$0xff]  ;;  %v195_v40 = vld [vmem:[#allocation5 + $0xc8] sm:$0xff]  ;;  %v196_v42 = vld [vmem:[#allocation5 + $0xd0] sm:$0xff] }
  0x40   :  { %775 = vmatprep.subr.bf16.mxu1 %v958_v0  ;;  %v785_v41 = vpack.c.bf16 %v195_v40, %v194_v39  ;;  %v197_v43 = vld [vmem:[#allocation5 + $0xd8] sm:$0xff]  ;;  %v198_v45 = vld [vmem:[#allocation5 + $0xe0] sm:$0xff]  ;;  %v199_v46 = vld [vmem:[#allocation5 + $0xe8] sm:$0xff] }
  0x41   :  { %v788_v44 = vpack.c.bf16 %v197_v43, %v196_v42  ;;  %v791_v47 = vpack.c.bf16 %v199_v46, %v198_v45  ;;  %v200_v48 = vld [vmem:[#allocation5 + $0xf0] sm:$0xff]  ;;  %v201_v49 = vld [vmem:[#allocation5 + $0xf8] sm:$0xff]  ;;  %v308_v23 = vld [vmem:[#allocation5 + $0x100] sm:$0xff] }
  0x42   :  { %756 = vmatpush3.bf16.msra.mxu0 %v755_v10  ;;  %v794_v50 = vpack.c.bf16 %v201_v49, %v200_v48  ;;  %v175_v10 = vshrl.u32 %v174_v9, 7  ;;  %v167_v11 = vld [vmem:[%s1122_s2] sm:$0x1]  ;;  %v309_v24 = vld [vmem:[#allocation5 + $0x108] sm:$0xff]  ;;  %v312_v29 = vld [vmem:[#allocation5 + $0x120] sm:$0xff] }
  0x43   :  { %757 = vmatprep.subr.bf16.mxu0 %v958_v0  ;;  %777 = vmatpush3.bf16.msra.mxu1 %v776_v32  ;;  %v171_v15 = vld [vmem:[%s1123_s3] sm:$0x1]  ;;  %v313_v30 = vld [vmem:[#allocation5 + $0x128] sm:$0xff]  ;;  %v314_v32 = vld [vmem:[#allocation5 + $0x130] sm:$0xff] }
  0x44   :  { %778 = vmatprep.subr.bf16.mxu1 %v958_v0  ;;  %v1066_v12 = vsub.s32 0, %v175_v10  ;;  %v311_v27 = vld [vmem:[#allocation5 + $0x118] sm:$0xff]  ;;  %v803_v31 = vpack.c.bf16 %v313_v30, %v312_v29  ;;  %v316_v34 = vld [vmem:[#allocation5 + $0x140] sm:$0xff]  ;;  %v318_v37 = vld [vmem:[#allocation5 + $0x150] sm:$0xff] }
  0x45   :  { %v320_v40 = vld [vmem:[#allocation5 + $0x160] sm:$0xff]  ;;  %v322_v43 = vld [vmem:[#allocation5 + $0x170] sm:$0xff]  ;;  %v438_v29 = vld [vmem:[#allocation7 + $0x48] sm:$0xff] }
  0x46   :  { %759 = vmatpush3.bf16.msra.mxu0 %v758_v13 }
  0x47   :  { %760 = vmatprep.subr.bf16.mxu0 %v958_v0  ;;  %780 = vmatpush3.bf16.msra.mxu1 %v779_v35  ;;  %v317_v35 = vld [vmem:[#allocation5 + $0x148] sm:$0xff] }
  0x48   :  { %781 = vmatprep.subr.bf16.mxu1 %v958_v0  ;;  %v809_v36 = vpack.c.bf16 %v317_v35, %v316_v34  ;;  %v442_v34 = vld [vmem:[#allocation7 + $0x68] sm:$0xff] }
  0x4a   :  { %762 = vmatpush3.bf16.msra.mxu0 %v761_v16 }
  0x4b   :  { %763 = vmatprep.subr.bf16.mxu0 %v958_v0  ;;  %783 = vmatpush3.bf16.msra.mxu1 %v782_v38  ;;  %v319_v38 = vld [vmem:[#allocation5 + $0x158] sm:$0xff] }
  0x4c   :  { %784 = vmatprep.subr.bf16.mxu1 %v958_v0  ;;  %v812_v39 = vpack.c.bf16 %v319_v38, %v318_v37  ;;  %v444_v37 = vld [vmem:[#allocation7 + $0x78] sm:$0xff] }
  0x4e   :  { %765 = vmatpush3.bf16.msra.mxu0 %v764_v19 }
  0x4f   :  { %766 = vmatprep.subr.bf16.mxu0 %v958_v0  ;;  %786 = vmatpush3.bf16.msra.mxu1 %v785_v41  ;;  %v321_v41 = vld [vmem:[#allocation5 + $0x168] sm:$0xff] }
  0x50   :  { %787 = vmatprep.subr.bf16.mxu1 %v958_v0  ;;  %v815_v42 = vpack.c.bf16 %v321_v41, %v320_v40 }
  0x52   :  { %768 = vmatpush3.bf16.msra.mxu0 %v767_v22 }
  0x53   :  { %769 = vmatprep.subr.bf16.mxu0 %v958_v0  ;;  %789 = vmatpush3.bf16.msra.mxu1 %v788_v44  ;;  %v323_v44 = vld [vmem:[#allocation5 + $0x178] sm:$0xff] }
  0x54   :  { %790 = vmatprep.subr.bf16.mxu1 %v958_v0  ;;  %v818_v45 = vpack.c.bf16 %v323_v44, %v322_v43 }
  0x56   :  { %771 = vmatpush3.bf16.msra.mxu0 %v770_v25  ;;  %v797_v25 = vpack.c.bf16 %v309_v24, %v308_v23  ;;  %v434_v23 = vld [vmem:[#allocation7 + $0x28] sm:$0xff] }
  0x57   :  { %796 = vmatprep.subr.bf16.mxu0 %v958_v0  ;;  %792 = vmatpush3.bf16.msra.mxu1 %v791_v47 }
  0x58   :  { %793 = vmatprep.subr.bf16.mxu1 %v958_v0 }
  0x59   :  { %641 = vmatmul.mubr.f32.vlgmr.msra.gmra.mrb[0].mxu0 %v63_v26  ;;  %v310_v26 = vld [vmem:[#allocation5 + $0x110] sm:$0xff] }
  0x5a   :  { %710 = vmatprep.mubr.msk.f32.mxu0 %vm959_vm0, %v960_v1  ;;  %798 = vmatpush3.bf16.msra.mxu0 %v797_v25  ;;  %v800_v28 = vpack.c.bf16 %v311_v27, %v310_v26  ;;  %v435_v25 = vld [vmem:[#allocation7 + $0x30] sm:$0xff]  ;;  %v436_v26 = vld [vmem:[#allocation7 + $0x38] sm:$0xff] }
  0x5b   :  { %795 = vmatpush3.bf16.msra.mxu1 %v794_v50  ;;  %799 = vmatprep.subr.bf16.mxu0 %v958_v0  ;;  %v830_v27 = vpack.c.bf16 %v436_v26, %v435_v25 }
  0x5c   :  { %820 = vmatprep.subr.bf16.mxu1 %v958_v0 }
  0x5e   :  { %801 = vmatpush3.bf16.msra.mxu0 %v800_v28  ;;  %v437_v28 = vld [vmem:[#allocation7 + $0x40] sm:$0xff] }
  0x5f   :  { %802 = vmatprep.subr.bf16.mxu0 %v958_v0  ;;  %v833_v30 = vpack.c.bf16 %v438_v29, %v437_v28 }
  0x62   :  { %804 = vmatpush3.bf16.msra.mxu0 %v803_v31  ;;  %v439_v31 = vld [vmem:[#allocation7 + $0x50] sm:$0xff] }
  0x63   :  { %805 = vmatprep.subr.bf16.mxu0 %v958_v0 }
 0x12c   :  { %v146_v51 = vpop.f32.mrb[0].mxu0 }
 0x12d   :  { %v150_v52 = vrot.slane %v146_v51, 4  ;;  %v157_v53 = vmul.f32 %v146_v51, %v146_v51  ;;  %v642_v54 = vpop.f32.mrb[1].mxu0 }
 0x12f   :  { %v151_v55 = vadd.f32 %v150_v52, %v146_v51  ;;  %v158_v56 = vrot.slane %v157_v53, 4 }
 0x131   :  { %v152_v57 = vrot.slane %v151_v55, 2  ;;  %v159_v58 = vadd.f32 %v158_v56, %v157_v53 }
 0x133   :  { %v153_v59 = vadd.f32 %v152_v57, %v151_v55  ;;  %v160_v60 = vrot.slane %v159_v58, 2 }
 0x135   :  { %v154_v61 = vrot.slane %v153_v59, 1  ;;  %v161_v62 = vadd.f32 %v160_v60, %v159_v58 }
 0x137   :  { %v155_v63 = vadd.f32 %v154_v61, %v153_v59  ;;  %v162_v2 = vrot.slane %v161_v62, 1 }
 0x139   :  { %v156_v3 = vmul.f32 0.125, %v155_v63  ;;  %v163_v4 = vadd.f32 %v162_v2, %v161_v62 }
 0x13b   :  { %v164_v5 = vmul.f32 0.125, %v163_v4  ;;  %v165_v6 = vmul.f32 %v156_v3, %v156_v3  ;;  %v289_v4 = vld [vmem:[%s1122_s2 + $0x1] sm:$0x1] }
 0x13d   :  { %v166_v7 = vsub.f32 %v164_v5, %v165_v6 }
 0x13f   :  { %v168_v8 = vadd.f32 1e-05, %v166_v7  ;;  %v293_v7 = vld [vmem:[%s1123_s3 + $0x1] sm:$0x1] }
 0x141   :  { %853 = vrsqrt.f32 %v168_v8 }
 0x14b   :  { %v854_v13 = vpop.eup %853 }
 0x14c   :  { %v170_v14 = vmul.f32 %v854_v13, %v167_v11 }
 0x14e   :  { %v177_v16 = vrot.slane %v170_v14, %v1066_v12  ;;  %v172_v17 = vmul.f32 %v170_v14, %v156_v3 }
 0x150   :  { %v173_v18 = vsub.f32 %v171_v15, %v172_v17  ;;  %v178_v19 = vmul.f32 %v177_v16, %v146_v51  ;;  %v429_v16 = vld [vmem:[#allocation7] sm:$0xff]  ;;  %v430_v17 = vld [vmem:[#allocation7 + $0x8] sm:$0xff] }
 0x152   :  { %v182_v20 = vrot.slane %v173_v18, %v1066_v12  ;;  %v821_v18 = vpack.c.bf16 %v430_v17, %v429_v16 }
 0x154   :  { %v183_v21 = vadd.f32 %v182_v20, %v178_v19  ;;  %v431_v19 = vld [vmem:[#allocation7 + $0x10] sm:$0xff]  ;;  %v432_v20 = vld [vmem:[#allocation7 + $0x18] sm:$0xff] }
 0x156   :  { %v184_v22 = vmax.f32 %v183_v21, 0.0  ;;  %v824_v21 = vpack.c.bf16 %v432_v20, %v431_v19 }
 0x158   :  { %676 = vmatmul.mubr.f32.vlgmr.msra.gmra.mrb[0].mxu1 %v184_v22  ;;  %v433_v22 = vld [vmem:[#allocation7 + $0x20] sm:$0xff] }
 0x159   :  { %745 = vmatprep.mubr.msk.f32.mxu1 %vm959_vm0, %v960_v1  ;;  %v315_v1 = vld [vmem:[#allocation5 + $0x138] sm:$0xff]  ;;  %822 = vmatpush3.bf16.msra.mxu1 %v821_v18  ;;  %v827_v24 = vpack.c.bf16 %v434_v23, %v433_v22 }
 0x15a   :  { %v806_v33 = vpack.c.bf16 %v315_v1, %v314_v32  ;;  %823 = vmatprep.subr.bf16.mxu1 %v958_v0  ;;  %v440_v32 = vld [vmem:[#allocation7 + $0x58] sm:$0xff] }
 0x15b   :  { %v836_v1 = vpack.c.bf16 %v440_v32, %v439_v31 }
 0x15c   :  { %807 = vmatpush3.bf16.msra.mxu0 %v806_v33  ;;  %v441_v33 = vld [vmem:[#allocation7 + $0x60] sm:$0xff] }
 0x15d   :  { %808 = vmatprep.subr.bf16.mxu0 %v958_v0  ;;  %825 = vmatpush3.bf16.msra.mxu1 %v824_v21  ;;  %v839_v35 = vpack.c.bf16 %v442_v34, %v441_v33 }
 0x15e   :  { %826 = vmatprep.subr.bf16.mxu1 %v958_v0 }
 0x160   :  { %810 = vmatpush3.bf16.msra.mxu0 %v809_v36  ;;  %v443_v36 = vld [vmem:[#allocation7 + $0x70] sm:$0xff] }
 0x161   :  { %811 = vmatprep.subr.bf16.mxu0 %v958_v0  ;;  %828 = vmatpush3.bf16.msra.mxu1 %v827_v24  ;;  %v842_v38 = vpack.c.bf16 %v444_v37, %v443_v36 }
 0x162   :  { %829 = vmatprep.subr.bf16.mxu1 %v958_v0 }
 0x164   :  { %813 = vmatpush3.bf16.msra.mxu0 %v812_v39 }
 0x165   :  { %814 = vmatprep.subr.bf16.mxu0 %v958_v0  ;;  %831 = vmatpush3.bf16.msra.mxu1 %v830_v27 }
 0x166   :  { %832 = vmatprep.subr.bf16.mxu1 %v958_v0 }
 0x168   :  { %816 = vmatpush3.bf16.msra.mxu0 %v815_v42 }
 0x169   :  { %817 = vmatprep.subr.bf16.mxu0 %v958_v0  ;;  %834 = vmatpush3.bf16.msra.mxu1 %v833_v30 }
 0x16a   :  { %835 = vmatprep.subr.bf16.mxu1 %v958_v0 }
 0x16c   :  { %819 = vmatpush3.bf16.msra.mxu0 %v818_v45 }
 0x16d   :  { %837 = vmatpush3.bf16.msra.mxu1 %v836_v1 }
 0x16e   :  { %838 = vmatprep.subr.bf16.mxu1 %v958_v0 }
 0x171   :  { %840 = vmatpush3.bf16.msra.mxu1 %v839_v35 }
 0x172   :  { %841 = vmatprep.subr.bf16.mxu1 %v958_v0 }
 0x175   :  { %843 = vmatpush3.bf16.msra.mxu1 %v842_v38 }
 0x22b   :  { %v268_v46 = vpop.f32.mrb[0].mxu1 }
 0x22c   :  { %v272_v47 = vrot.slane %v268_v46, 4  ;;  %v279_v48 = vmul.f32 %v268_v46, %v268_v46  ;;  %v677_v49 = vpop.f32.mrb[1].mxu1 }
 0x22e   :  { %v273_v50 = vadd.f32 %v272_v47, %v268_v46  ;;  %v280_v51 = vrot.slane %v279_v48, 4 }
 0x230   :  { %v274_v52 = vrot.slane %v273_v50, 2  ;;  %v281_v53 = vadd.f32 %v280_v51, %v279_v48 }
 0x232   :  { %v275_v54 = vadd.f32 %v274_v52, %v273_v50  ;;  %v282_v55 = vrot.slane %v281_v53, 2 }
 0x234   :  { %v276_v56 = vrot.slane %v275_v54, 1  ;;  %v283_v57 = vadd.f32 %v282_v55, %v281_v53 }
 0x236   :  { %v277_v58 = vadd.f32 %v276_v56, %v275_v54  ;;  %v284_v59 = vrot.slane %v283_v57, 1 }
 0x238   :  { %v278_v60 = vmul.f32 0.125, %v277_v58  ;;  %v285_v61 = vadd.f32 %v284_v59, %v283_v57  ;;  %v411_v58 = vld [vmem:[%s1122_s2 + $0x2] sm:$0x1]  ;;  %s961_s2 = smov [#allocation8]  }
 0x239   :  { %s529_s1 = sshll.u32 %s961_s2, 4  ;;  %s530_s1 = int_to_ptr.vmem [resolvable:$true] %s529_s1 }
 0x23a   :  { %v286_v62 = vmul.f32 0.125, %v285_v61  ;;  %v287_v63 = vmul.f32 %v278_v60, %v278_v60  ;;  %v415_v61 = vld [vmem:[%s1123_s3 + $0x2] sm:$0x1]  ;;  %s925_s3 = scalar_lea.vmem %s530_s1, 128  ;;  %p930_p11 = scmp.lt.s32.totalorder %s530_s1, %s530_s1 }
 0x23b   :  { %p926_p10 = scmp.ne.s32.totalorder %s530_s1, %s925_s3  ;;  %p931_p12 = scmp.lt.s32.totalorder %s925_s3, %s925_s3 }
 0x23c   :  { %v288_v2 = vsub.f32 %v286_v62, %v287_v63 }
 0x23d   :  { %p932_p13 = por %p931_p12, %p930_p11 }
 0x23e   :  { %v290_v3 = vadd.f32 1e-05, %v288_v2 }
 0x23f   :  { %p933_p0 = pnand %p932_p13, %p926_p10 }
 0x240   :  { %855 = vrsqrt.f32 %v290_v3 }
 0x24a   :  { %v856_v5 = vpop.eup %855 }
 0x24b   :  { %v292_v6 = vmul.f32 %v856_v5, %v289_v4 }
 0x24d   :  { %v294_v8 = vmul.f32 %v292_v6, %v278_v60  ;;  %v299_v9 = vrot.slane %v292_v6, %v1066_v12 }
 0x24f   :  { %v295_v10 = vsub.f32 %v293_v7, %v294_v8  ;;  %v300_v11 = vmul.f32 %v299_v9, %v268_v46  ;;  %v539_v7 = vld [vmem:[%s1125_s5] ss:$0 sm:$0xff] }
 0x251   :  { %v304_v13 = vrot.slane %v295_v10, %v1066_v12 }
 0x253   :  { %v305_v14 = vadd.f32 %v304_v13, %v300_v11 }
 0x255   :  { %v306_v15 = vmax.f32 %v305_v14, 0.0 }
 0x257   :  { %711 = vmatmul.mubr.f32.vlgmr.msra.gmra.mrb[2].mxu0 %v306_v15 }
 0x32a   :  { %v390_v39 = vpop.f32.mrb[2].mxu0 }
 0x32b   :  { %v394_v40 = vrot.slane %v390_v39, 4  ;;  %v401_v41 = vmul.f32 %v390_v39, %v390_v39  ;;  %v712_v42 = vpop.f32.mrb[3].mxu0 }
 0x32d   :  { %v395_v43 = vadd.f32 %v394_v40, %v390_v39  ;;  %v402_v44 = vrot.slane %v401_v41, 4 }
 0x32f   :  { %v396_v45 = vrot.slane %v395_v43, 2  ;;  %v403_v46 = vadd.f32 %v402_v44, %v401_v41 }
 0x331   :  { %v397_v47 = vadd.f32 %v396_v45, %v395_v43  ;;  %v404_v48 = vrot.slane %v403_v46, 2 }
 0x333   :  { %v398_v49 = vrot.slane %v397_v47, 1  ;;  %v405_v50 = vadd.f32 %v404_v48, %v403_v46 }
 0x335   :  { %v399_v51 = vadd.f32 %v398_v49, %v397_v47  ;;  %v406_v52 = vrot.slane %v405_v50, 1 }
 0x337   :  { %v400_v53 = vmul.f32 0.125, %v399_v51  ;;  %v407_v0 = vadd.f32 %v406_v52, %v405_v50 }
 0x339   :  { %v408_v54 = vmul.f32 0.125, %v407_v0  ;;  %v409_v55 = vmul.f32 %v400_v53, %v400_v53 }
 0x33b   :  { %v410_v56 = vsub.f32 %v408_v54, %v409_v55 }
 0x33d   :  { %v412_v57 = vadd.f32 1e-05, %v410_v56 }
 0x33f   :  { %857 = vrsqrt.f32 %v412_v57 }
 0x349   :  { %v858_v59 = vpop.eup %857 }
 0x34a   :  { %v414_v60 = vmul.f32 %v858_v59, %v411_v58 }
 0x34c   :  { %v416_v62 = vmul.f32 %v414_v60, %v400_v53  ;;  %v421_v63 = vrot.slane %v414_v60, %v1066_v12 }
 0x34e   :  { %v417_v2 = vsub.f32 %v415_v61, %v416_v62  ;;  %v422_v3 = vmul.f32 %v421_v63, %v390_v39 }
 0x350   :  { %v426_v4 = vrot.slane %v417_v2, %v1066_v12 }
 0x352   :  { %v427_v5 = vadd.f32 %v426_v4, %v422_v3 }
 0x354   :  { %v428_v6 = vmax.f32 %v427_v5, 0.0 }
 0x356   :  { %746 = vmatmul.mubr.f32.vlgmr.msra.gmra.mrb[2].mxu1 %v428_v6 }
 0x429   :  { %v518_v8 = vpop.f32.mrb[2].mxu1 }
 0x42a   :  { %v519_v9 = vadd.f32 %v539_v7, %v518_v8  ;;  %v747_v10 = vpop.f32.mrb[3].mxu1 }
 0x42c   :  { %522 = vst [vmem:[#allocation8] sm:$0xff] %v519_v9 }
 0x42d   :  { %936 = shalt.err (!%p933_p0)
}
 0x42e   :  { %s937_s24 = scalar_lea.hbm %s1126_s6, 128 }
 0x42f   :  { %p938_p1 = scmp.ne.s32.totalorder %s1126_s6, %s937_s24  ;;  %p941_p2 = scmp.lt.u32.totalorder %s937_s24, %s1126_s6 }
 0x431   :  { %p943_p3 = pnand %p941_p2, %p938_p1 }
 0x433   :  { %946 = shalt.err (!%p943_p3)
}
 0x434   :  { %532 = dma.vmem_to_hbm [thread:$0]  %s530_s1, 128, %s1126_s6, [#allocation4]  }
 0x435   :  { %951 = dma.done.wait [#allocation4], 128  }
 0x436   :  { %952 = vsyncadd [#allocation4], 4294967168 }
 0x437   :  { %536 = vsyncpa [#allocation3], 1 }
 0x438   :  { %537 = vsyncpa [#allocation6], 1 }
 0x439   :  { %538 = vsyncpa [#allocation4], 1 }

</bundles_post_ra>
